<compile_context>
chip_gen: v5e
topology: v5e:2x2
jax: 0.10.0
libtpu: 0.0.40
codegen_flags: <defaults>
</compile_context>

<pallas_src>
import jax
import jax.numpy as jnp
import numpy as np
from jax import lax
from jax.experimental import pallas as pl
from jax.experimental.pallas import tpu as pltpu

EPS = 1e-5  # nn.InstanceNorm2d default


def _round_up(x, m):
    return -(-x // m) * m


def _make_conv_block_kernel(tap_offsets, cin_p, lane_len, l_valid, wp, wout,
                            inv_hwo, eps):
    """Fused conv + instance-norm kernel (one sample per grid step)."""

    def kernel(x_ref, w_ref, gb_ref, o_ref, slab_ref):
        # x_ref:    (1, Cin_p, Lp)         bf16 flattened reflect-padded input
        # w_ref:    (Cout, n_taps*Cin_p)   bf16 repacked weights
        # gb_ref:   (Cout, 2)              f32  [:,0]=gamma, [:,1]=beta
        # o_ref:    (1, Cout, L_pad)       out dtype
        # slab_ref: (n_taps*Cin_p, L_pad)  bf16 VMEM scratch (im2col-lite slab)

        # Build the K = n_taps*Cin_p RHS slab with one shifted copy per conv
        # tap (static unroll), then issue a single MXU matmul with that K.
        for t, off in enumerate(tap_offsets):
            slab_ref[t * cin_p:(t + 1) * cin_p, :] = x_ref[0, :, off:off + lane_len]
        acc = jnp.dot(w_ref[...], slab_ref[...],
                      preferred_element_type=jnp.float32)        # (Cout, L_pad) f32

        # InstanceNorm2d stats over the HWo valid positions (biased variance,
        # eps=1e-5).  The validity mask (wrap columns + lane padding excluded)
        # is generated in-kernel and already carries the 1/HWo factor, so the
        # masked sums directly give mean and E[x^2] in ONE pass over acc.
        col = lax.broadcasted_iota(jnp.int32, (1, lane_len), 1).astype(jnp.float32)
        colw = col - jnp.floor(col / float(wp)) * float(wp)       # column within row
        valid = (col < float(l_valid)) & (colw < float(wout))
        mask = jnp.where(valid, jnp.float32(inv_hwo), jnp.float32(0.0))  # (1, L_pad)

        am = acc * mask
        mean = jnp.sum(am, axis=1, keepdims=True)                 # (Cout, 1)
        ex2 = jnp.sum(am * acc, axis=1, keepdims=True)            # (Cout, 1)
        var = ex2 - mean * mean

        gamma = gb_ref[:, 0:1]
        beta = gb_ref[:, 1:2]
        scale = gamma * lax.rsqrt(var + eps)                      # EUP slot
        shift = beta - mean * scale
        # activation: nn.Identity() (the module default when activation=None)
        # TODO(synk): apply a non-identity activation module here if supplied.
        o_ref[0] = (acc * scale + shift).astype(o_ref.dtype)

    return kernel


def conv_block(x, weight, bias, gamma, beta, *, stride=1, padding=1, eps=EPS,
               compute_dtype=jnp.bfloat16, out_dtype=jnp.float32, crop=True):
    """Forward of ConvBlock (up_sampling=False, activation=Identity).

    crop=False returns the wide (N, Cout, L_pad) layout so a downstream
    consumer can fuse the column crop (saves one HBM slice copy);
    out_dtype=jnp.bfloat16 halves output HBM traffic when downstream allows.
    """
    # The conv bias is mathematically a no-op here: a per-channel constant
    # added before InstanceNorm is removed exactly by the mean subtraction.
    del bias
    if stride != 1:
        # TODO(synk): strided (downsampling) conv and the up_sampling=True
        # (bilinear Upsample) path are not implemented in this shifted-slab
        # kernel; only stride=1 is supported.
        raise NotImplementedError("conv_block Pallas kernel supports stride=1 only")

    N, Cin, H, W = x.shape
    Cout, Cin_w, KH, KW = weight.shape
    assert Cin_w == Cin

    Hp, Wp = H + 2 * padding, W + 2 * padding
    Hout, Wout = Hp - KH + 1, Wp - KW + 1
    HWo = Hout * Wout
    L = Hout * Wp                                    # wide spatial length
    lane_len = _round_up(L, 128)                     # 128-aligned output lane dim
    # Channel padding to the sublane-packing tile of compute_dtype (16 for
    # bf16) so each per-tap block written into the slab is tile-aligned.
    cin_align = 8 * (4 // jnp.dtype(compute_dtype).itemsize)
    Cin_p = _round_up(Cin, cin_align)
    max_off = (KH - 1) * Wp + (KW - 1)
    Lp = _round_up(max(max_off + lane_len, Hp * Wp), 128)

    # Reflect pad (once, cheap) + channel zero-pad + flatten spatial.
    # Transpose-free; the flatten is a contiguous reshape.
    xp = jnp.pad(x, ((0, 0), (0, 0), (padding, padding), (padding, padding)),
                 mode="reflect")
    xp = jnp.pad(xp, ((0, 0), (0, Cin_p - Cin), (0, 0), (0, 0)))
    xf = xp.reshape(N, Cin_p, Hp * Wp)
    xf = jnp.pad(xf, ((0, 0), (0, 0), (0, Lp - Hp * Wp))).astype(compute_dtype)

    # Repacked weights (Cout, KH*KW*Cin_p); K ordering = (tap, channel), taps
    # ordered to match tap_offsets below.
    wt = jnp.transpose(weight, (2, 3, 0, 1)).reshape(KH * KW, Cout, Cin)
    wt = jnp.pad(wt, ((0, 0), (0, 0), (0, Cin_p - Cin)))
    wt = jnp.transpose(wt, (1, 0, 2)).reshape(Cout, KH * KW * Cin_p)
    wt = wt.astype(compute_dtype)

    gb = jnp.stack([gamma, beta], axis=1).astype(jnp.float32)        # (Cout, 2)

    tap_offsets = tuple(kh * Wp + kw for kh in range(KH) for kw in range(KW))
    kernel = _make_conv_block_kernel(tap_offsets, Cin_p, lane_len, L, Wp, Wout,
                                     1.0 / HWo, eps)

    # Shape-derived VMEM budget (double-buffered in/out blocks + weights +
    # slab scratch), clamped to the chip's capacity with headroom.
    itemsize_c = jnp.dtype(compute_dtype).itemsize
    itemsize_o = jnp.dtype(out_dtype).itemsize
    bytes_need = (2 * (Cin_p * Lp * itemsize_c + Cout * lane_len * itemsize_o)
                  + 2 * (Cout * KH * KW * Cin_p * itemsize_c + Cout * 2 * 4)
                  + KH * KW * Cin_p * lane_len * itemsize_c)
    try:
        vmem_cap = pltpu.get_tpu_info().vmem_capacity_bytes
    except Exception:
        vmem_cap = 64 * 1024 * 1024
    vmem_limit = int(min(max(4 * bytes_need, 32 * 1024 * 1024),
                         int(0.9 * vmem_cap)))

    # TODO(synk): for very large Hout*Wp (per-sample slabs beyond a few MiB,
    # esp. on v7x's 64 MiB VMEM) add a spatial-tile grid axis with sum/sumsq
    # scratch accumulators + a pl.when finalize, and/or fold several samples
    # per step, so per-step tiles stay large and both v7x TensorCores get work
    # independent of N.  At ConvBlock-typical sizes the whole sample fits.
    out_wide = pl.pallas_call(
        kernel,
        out_shape=jax.ShapeDtypeStruct((N, Cout, lane_len), out_dtype),
        grid_spec=pltpu.PrefetchScalarGridSpec(
            num_scalar_prefetch=0,
            grid=(N,),
            in_specs=[
                pl.BlockSpec((1, Cin_p, Lp), lambda n: (n, 0, 0)),
                pl.BlockSpec((Cout, KH * KW * Cin_p), lambda n: (0, 0)),
                pl.BlockSpec((Cout, 2), lambda n: (0, 0)),
            ],
            out_specs=pl.BlockSpec((1, Cout, lane_len), lambda n: (n, 0, 0)),
            scratch_shapes=[pltpu.VMEM((KH * KW * Cin_p, lane_len), compute_dtype)],
        ),
        compiler_params=pltpu.CompilerParams(
            dimension_semantics=("parallel",),
            vmem_limit_bytes=vmem_limit,
        ),
    )(xf, wt, gb)

    if not crop:
        return out_wide        # (N, Cout, L_pad): wide layout, crop fused later
    # Drop lane padding and the Wp-Wout wrap columns -> NCHW (no transpose).
    return out_wide[:, :, :L].reshape(N, Cout, Hout, Wp)[:, :, :, :Wout]


def _reference(x, weight, bias, gamma, beta, *, stride=1, padding=1,
               eps=EPS, quant_dtype=None):
    """Pure-JAX reference mirroring PyTorch ConvBlock semantics.

    quant_dtype simulates the kernel's bf16 MXU operands (cast inputs/weights
    to bf16 and back; products and accumulation stay f32, like the MXU).
    """
    if quant_dtype is not None:
        x = x.astype(quant_dtype).astype(jnp.float32)
        weight = weight.astype(quant_dtype).astype(jnp.float32)
    xp = jnp.pad(x, ((0, 0), (0, 0), (padding, padding), (padding, padding)),
                 mode="reflect")
    y = lax.conv_general_dilated(
        xp, weight, window_strides=(stride, stride), padding="VALID",
        dimension_numbers=("NCHW", "OIHW", "NCHW"))
    y = y + bias.reshape(1, -1, 1, 1)   # cancelled exactly by the mean subtraction
    mean = jnp.mean(y, axis=(2, 3), keepdims=True)
    var = jnp.mean((y - mean) ** 2, axis=(2, 3), keepdims=True)
    y = (y - mean) * lax.rsqrt(var + eps)
    return y * gamma.reshape(1, -1, 1, 1) + beta.reshape(1, -1, 1, 1)


if __name__ == "__main__":
    # Small shapes consistent with ConvBlock(in_channels=4, out_channels=8, stride=1)
    N, Cin, H, W = 2, 4, 16, 16
    Cout, KH, KW = 8, 3, 3
    stride, padding = 1, 1

    key = jax.random.PRNGKey(0)
    kx, kw, kb, kg, kbe = jax.random.split(key, 5)
    x = jax.random.normal(kx, (N, Cin, H, W), dtype=jnp.float32)
    weight = jax.random.normal(kw, (Cout, Cin, KH, KW), dtype=jnp.float32) * 0.1
    bias = jax.random.normal(kb, (Cout,), dtype=jnp.float32) * 0.1
    gamma = 1.0 + 0.1 * jax.random.normal(kg, (Cout,), dtype=jnp.float32)
    beta = 0.1 * jax.random.normal(kbe, (Cout,), dtype=jnp.float32)

    out = conv_block(x, weight, bias, gamma, beta, stride=stride, padding=padding)
    out = jax.block_until_ready(out)
    assert out.shape == (N, Cout, H, W), out.shape

    # Tight check vs a reference with the same bf16 operand quantization
    # (and keeping the conv bias, which the kernel drops — it cancels exactly).
    ref_q = _reference(x, weight, bias, gamma, beta, stride=stride,
                       padding=padding, quant_dtype=jnp.bfloat16)
    np.testing.assert_allclose(np.asarray(out), np.asarray(ref_q),
                               atol=1e-3, rtol=1e-3)

    # Loose check vs the pure-f32 module semantics (bf16 operand quantization
    # for the MXU is the only source of deviation).
    ref_f32 = _reference(x, weight, bias, gamma, beta, stride=stride,
                         padding=padding, quant_dtype=None)
    np.testing.assert_allclose(np.asarray(out), np.asarray(ref_f32),
                               atol=5e-2, rtol=5e-2)

    print("KERNEL_OK")
</pallas_src>

<mosaic_0001>
module attributes {stable_mosaic.version = 11 : i64} {
  func.func @kernel(%arg0: i32, %arg1: memref<1x16x512xbf16, #tpu.memory_space<vmem>>, %arg2: memref<8x144xbf16, #tpu.memory_space<vmem>>, %arg3: memref<8x2xf32, #tpu.memory_space<vmem>>, %arg4: memref<1x8x384xf32, #tpu.memory_space<vmem>>, %arg5: memref<144x384xbf16, #tpu.memory_space<vmem>>) attributes {dimension_semantics = [#tpu.dimension_semantics<parallel>], iteration_bounds = array<i64: 2>, scalar_prefetch = 0 : i64, scratch_operands = 1 : i64, tpu.core_type = #tpu.core_type<tc>, window_params = [{transform_indices = @transform_0, window_bounds = array<i64: 1, 16, 512>}, {pipeline_mode = #tpu.pipeline_mode<synchronous>, transform_indices = @transform_1, window_bounds = array<i64: 8, 144>}, {pipeline_mode = #tpu.pipeline_mode<synchronous>, transform_indices = @transform_2, window_bounds = array<i64: 8, 2>}, {transform_indices = @transform_3, window_bounds = array<i64: 1, 8, 384>}]} {
    %c0 = arith.constant 0 : index
    %c0_0 = arith.constant 0 : index
    %c0_1 = arith.constant 0 : index
    %0 = vector.load %arg1[%c0, %c0_0, %c0_1] : memref<1x16x512xbf16, #tpu.memory_space<vmem>>, vector<1x16x384xbf16>
    %1 = vector.shape_cast %0 : vector<1x16x384xbf16> to vector<16x384xbf16>
    %c0_2 = arith.constant 0 : index
    %c0_3 = arith.constant 0 : index
    %2 = vector.load %arg5[%c0_2, %c0_3] : memref<144x384xbf16, #tpu.memory_space<vmem>>, vector<16x384xbf16>
    tpu.vector_store %arg5[%c0_2, %c0_3], %1 {strides = array<i32>} : memref<144x384xbf16, #tpu.memory_space<vmem>>, vector<16x384xbf16>,
    %c0_4 = arith.constant 0 : index
    %c0_5 = arith.constant 0 : index
    %c1 = arith.constant 1 : index
    %3 = vector.load %arg1[%c0_4, %c0_5, %c1] : memref<1x16x512xbf16, #tpu.memory_space<vmem>>, vector<1x16x384xbf16>
    %4 = vector.shape_cast %3 : vector<1x16x384xbf16> to vector<16x384xbf16>
    %c16 = arith.constant 16 : index
    %c0_6 = arith.constant 0 : index
    %5 = vector.load %arg5[%c16, %c0_6] : memref<144x384xbf16, #tpu.memory_space<vmem>>, vector<16x384xbf16>
    tpu.vector_store %arg5[%c16, %c0_6], %4 {strides = array<i32>} : memref<144x384xbf16, #tpu.memory_space<vmem>>, vector<16x384xbf16>,
    %c0_7 = arith.constant 0 : index
    %c0_8 = arith.constant 0 : index
    %c2 = arith.constant 2 : index
    %6 = vector.load %arg1[%c0_7, %c0_8, %c2] : memref<1x16x512xbf16, #tpu.memory_space<vmem>>, vector<1x16x384xbf16>
    %7 = vector.shape_cast %6 : vector<1x16x384xbf16> to vector<16x384xbf16>
    %c32 = arith.constant 32 : index
    %c0_9 = arith.constant 0 : index
    %8 = vector.load %arg5[%c32, %c0_9] : memref<144x384xbf16, #tpu.memory_space<vmem>>, vector<16x384xbf16>
    tpu.vector_store %arg5[%c32, %c0_9], %7 {strides = array<i32>} : memref<144x384xbf16, #tpu.memory_space<vmem>>, vector<16x384xbf16>,
    %c0_10 = arith.constant 0 : index
    %c0_11 = arith.constant 0 : index
    %c18 = arith.constant 18 : index
    %9 = vector.load %arg1[%c0_10, %c0_11, %c18] : memref<1x16x512xbf16, #tpu.memory_space<vmem>>, vector<1x16x384xbf16>
    %10 = vector.shape_cast %9 : vector<1x16x384xbf16> to vector<16x384xbf16>
    %c48 = arith.constant 48 : index
    %c0_12 = arith.constant 0 : index
    %11 = vector.load %arg5[%c48, %c0_12] : memref<144x384xbf16, #tpu.memory_space<vmem>>, vector<16x384xbf16>
    tpu.vector_store %arg5[%c48, %c0_12], %10 {strides = array<i32>} : memref<144x384xbf16, #tpu.memory_space<vmem>>, vector<16x384xbf16>,
    %c0_13 = arith.constant 0 : index
    %c0_14 = arith.constant 0 : index
    %c19 = arith.constant 19 : index
    %12 = vector.load %arg1[%c0_13, %c0_14, %c19] : memref<1x16x512xbf16, #tpu.memory_space<vmem>>, vector<1x16x384xbf16>
    %13 = vector.shape_cast %12 : vector<1x16x384xbf16> to vector<16x384xbf16>
    %c64 = arith.constant 64 : index
    %c0_15 = arith.constant 0 : index
    %14 = vector.load %arg5[%c64, %c0_15] : memref<144x384xbf16, #tpu.memory_space<vmem>>, vector<16x384xbf16>
    tpu.vector_store %arg5[%c64, %c0_15], %13 {strides = array<i32>} : memref<144x384xbf16, #tpu.memory_space<vmem>>, vector<16x384xbf16>,
    %c0_16 = arith.constant 0 : index
    %c0_17 = arith.constant 0 : index
    %c20 = arith.constant 20 : index
    %15 = vector.load %arg1[%c0_16, %c0_17, %c20] : memref<1x16x512xbf16, #tpu.memory_space<vmem>>, vector<1x16x384xbf16>
    %16 = vector.shape_cast %15 : vector<1x16x384xbf16> to vector<16x384xbf16>
    %c80 = arith.constant 80 : index
    %c0_18 = arith.constant 0 : index
    %17 = vector.load %arg5[%c80, %c0_18] : memref<144x384xbf16, #tpu.memory_space<vmem>>, vector<16x384xbf16>
    tpu.vector_store %arg5[%c80, %c0_18], %16 {strides = array<i32>} : memref<144x384xbf16, #tpu.memory_space<vmem>>, vector<16x384xbf16>,
    %c0_19 = arith.constant 0 : index
    %c0_20 = arith.constant 0 : index
    %c36 = arith.constant 36 : index
    %18 = vector.load %arg1[%c0_19, %c0_20, %c36] : memref<1x16x512xbf16, #tpu.memory_space<vmem>>, vector<1x16x384xbf16>
    %19 = vector.shape_cast %18 : vector<1x16x384xbf16> to vector<16x384xbf16>
    %c96 = arith.constant 96 : index
    %c0_21 = arith.constant 0 : index
    %20 = vector.load %arg5[%c96, %c0_21] : memref<144x384xbf16, #tpu.memory_space<vmem>>, vector<16x384xbf16>
    tpu.vector_store %arg5[%c96, %c0_21], %19 {strides = array<i32>} : memref<144x384xbf16, #tpu.memory_space<vmem>>, vector<16x384xbf16>,
    %c0_22 = arith.constant 0 : index
    %c0_23 = arith.constant 0 : index
    %c37 = arith.constant 37 : index
    %21 = vector.load %arg1[%c0_22, %c0_23, %c37] : memref<1x16x512xbf16, #tpu.memory_space<vmem>>, vector<1x16x384xbf16>
    %22 = vector.shape_cast %21 : vector<1x16x384xbf16> to vector<16x384xbf16>
    %c112 = arith.constant 112 : index
    %c0_24 = arith.constant 0 : index
    %23 = vector.load %arg5[%c112, %c0_24] : memref<144x384xbf16, #tpu.memory_space<vmem>>, vector<16x384xbf16>
    tpu.vector_store %arg5[%c112, %c0_24], %22 {strides = array<i32>} : memref<144x384xbf16, #tpu.memory_space<vmem>>, vector<16x384xbf16>,
    %c0_25 = arith.constant 0 : index
    %c0_26 = arith.constant 0 : index
    %c38 = arith.constant 38 : index
    %24 = vector.load %arg1[%c0_25, %c0_26, %c38] : memref<1x16x512xbf16, #tpu.memory_space<vmem>>, vector<1x16x384xbf16>
    %25 = vector.shape_cast %24 : vector<1x16x384xbf16> to vector<16x384xbf16>
    %c128 = arith.constant 128 : index
    %c0_27 = arith.constant 0 : index
    %26 = vector.load %arg5[%c128, %c0_27] : memref<144x384xbf16, #tpu.memory_space<vmem>>, vector<16x384xbf16>
    tpu.vector_store %arg5[%c128, %c0_27], %25 {strides = array<i32>} : memref<144x384xbf16, #tpu.memory_space<vmem>>, vector<16x384xbf16>,
    %c0_28 = arith.constant 0 : index
    %c0_29 = arith.constant 0 : index
    %27 = vector.load %arg2[%c0_28, %c0_29] : memref<8x144xbf16, #tpu.memory_space<vmem>>, vector<8x144xbf16>
    %c0_30 = arith.constant 0 : index
    %c0_31 = arith.constant 0 : index
    %28 = vector.load %arg5[%c0_30, %c0_31] : memref<144x384xbf16, #tpu.memory_space<vmem>>, vector<144x384xbf16>
    %cst = arith.constant dense<0.000000e+00> : vector<8x384xf32>
    %29 = tpu.matmul %27, %28, %cst {dimension_numbers = #tpu.dot_dimension_numbers<[1], [0], [0], [1], [0, 0, 1, 1], [], []>} : vector<8x144xbf16>, vector<144x384xbf16>, vector<8x384xf32> -> vector<8x384xf32>
    %30 = tpu.iota {dimensions = array<i32: 1>} : vector<1x384xi32>
    %31 = arith.sitofp %30 : vector<1x384xi32> to vector<1x384xf32>
    %cst_32 = arith.constant 1.800000e+01 : f32
    %32 = vector.broadcast %cst_32 : f32 to vector<1x384xf32>
    %33 = arith.divf %31, %32 : vector<1x384xf32>
    %34 = math.floor %33 : vector<1x384xf32>
    %cst_33 = arith.constant 1.800000e+01 : f32
    %35 = vector.broadcast %cst_33 : f32 to vector<1x384xf32>
    %36 = arith.mulf %34, %35 : vector<1x384xf32>
    %37 = arith.subf %31, %36 : vector<1x384xf32>
    %cst_34 = arith.constant 2.880000e+02 : f32
    %38 = vector.broadcast %cst_34 : f32 to vector<1x384xf32>
    %39 = arith.cmpf olt, %31, %38 : vector<1x384xf32>
    %cst_35 = arith.constant 1.600000e+01 : f32
    %40 = vector.broadcast %cst_35 : f32 to vector<1x384xf32>
    %41 = arith.cmpf olt, %37, %40 : vector<1x384xf32>
    %42 = arith.andi %39, %41 : vector<1x384xi1>
    %cst_36 = arith.constant 3.906250e-03 : f32
    %cst_37 = arith.constant 0.000000e+00 : f32
    %43 = vector.broadcast %cst_36 : f32 to vector<1x384xf32>
    %44 = vector.broadcast %cst_37 : f32 to vector<1x384xf32>
    %45 = arith.select %42, %43, %44 : vector<1x384xi1>, vector<1x384xf32>
    %46 = vector.broadcast %45 : vector<1x384xf32> to vector<8x384xf32>
    %47 = arith.mulf %29, %46 : vector<8x384xf32>
    %cst_38 = arith.constant dense<0.000000e+00> : vector<8xf32>
    %48 = vector.multi_reduction <add>, %47, %cst_38 [1] : vector<8x384xf32> to vector<8xf32>
    %49 = vector.shape_cast %48 : vector<8xf32> to vector<8x1xf32>
    %50 = arith.mulf %47, %29 : vector<8x384xf32>
    %cst_39 = arith.constant dense<0.000000e+00> : vector<8xf32>
    %51 = vector.multi_reduction <add>, %50, %cst_39 [1] : vector<8x384xf32> to vector<8xf32>
    %52 = vector.shape_cast %51 : vector<8xf32> to vector<8x1xf32>
    %53 = arith.mulf %49, %49 : vector<8x1xf32>
    %54 = arith.subf %52, %53 : vector<8x1xf32>
    %c0_40 = arith.constant 0 : index
    %c0_41 = arith.constant 0 : index
    %55 = vector.load %arg3[%c0_40, %c0_41] : memref<8x2xf32, #tpu.memory_space<vmem>>, vector<8x1xf32>
    %c0_42 = arith.constant 0 : index
    %c1_43 = arith.constant 1 : index
    %56 = vector.load %arg3[%c0_42, %c1_43] : memref<8x2xf32, #tpu.memory_space<vmem>>, vector<8x1xf32>
    %cst_44 = arith.constant 9.99999974E-6 : f32
    %57 = vector.broadcast %cst_44 : f32 to vector<8x1xf32>
    %58 = arith.addf %54, %57 : vector<8x1xf32>
    %59 = math.rsqrt %58 : vector<8x1xf32>
    %60 = arith.mulf %55, %59 : vector<8x1xf32>
    %61 = arith.mulf %49, %60 : vector<8x1xf32>
    %62 = arith.subf %56, %61 : vector<8x1xf32>
    %63 = vector.broadcast %60 : vector<8x1xf32> to vector<8x384xf32>
    %64 = arith.mulf %29, %63 : vector<8x384xf32>
    %65 = vector.broadcast %62 : vector<8x1xf32> to vector<8x384xf32>
    %66 = arith.addf %64, %65 : vector<8x384xf32>
    %c0_45 = arith.constant 0 : index
    %c0_46 = arith.constant 0 : index
    %c0_47 = arith.constant 0 : index
    %67 = vector.load %arg4[%c0_45, %c0_46, %c0_47] : memref<1x8x384xf32, #tpu.memory_space<vmem>>, vector<1x8x384xf32>
    %68 = vector.shape_cast %67 : vector<1x8x384xf32> to vector<8x384xf32>
    %69 = vector.shape_cast %66 : vector<8x384xf32> to vector<1x8x384xf32>
    tpu.vector_store %arg4[%c0_45, %c0_46, %c0_47], %69 {strides = array<i32>} : memref<1x8x384xf32, #tpu.memory_space<vmem>>, vector<1x8x384xf32>,
    return
  }
  func.func @transform_0(%arg0: i32) -> (i32, i32, i32) {
    %c0_i32 = arith.constant 0 : i32
    %c0_i32_0 = arith.constant 0 : i32
    %c0_i32_1 = arith.constant 0 : i32
    return %arg0, %c0_i32, %c0_i32_0 : i32, i32, i32
  }
  func.func @transform_1(%arg0: i32) -> (i32, i32) {
    %c0_i32 = arith.constant 0 : i32
    %c0_i32_0 = arith.constant 0 : i32
    %c0_i32_1 = arith.constant 0 : i32
    return %c0_i32, %c0_i32_0 : i32, i32
  }
  func.func @transform_2(%arg0: i32) -> (i32, i32) {
    %c0_i32 = arith.constant 0 : i32
    %c0_i32_0 = arith.constant 0 : i32
    %c0_i32_1 = arith.constant 0 : i32
    return %c0_i32, %c0_i32_0 : i32, i32
  }
  func.func @transform_3(%arg0: i32) -> (i32, i32, i32) {
    %c0_i32 = arith.constant 0 : i32
    %c0_i32_0 = arith.constant 0 : i32
    %c0_i32_1 = arith.constant 0 : i32
    return %arg0, %c0_i32, %c0_i32_0 : i32, i32, i32
  }
}

</mosaic_0001>

<bundles_post_ra>
// kernel: tpu_custom_call.1
= control target key start
LH: loop header
LB: loop body
LE: loop exit
PB: predicated region body
PF: predicated region fallthrough
CT: control target
= control target key end

     0   :  { %8 = vsyncpa [#allocation4], 0  ;;  %s1511_s0 = inlined_call_operand.hbm [shape: bf16[2,16,512], index: 0, kind: input, shape index: {}]   ;;  %s1512_s1 = inlined_call_operand.vmem [shape: bf16[8,144], index: 1, kind: input, shape index: {}]   ;;  %s1513_s2 = inlined_call_operand.vmem [shape: f32[8,2], index: 2, kind: input, shape index: {}]   ;;  %s1514_s3 = inlined_call_operand.hbm [shape: f32[2,8,384], index: 3, kind: output, shape index: {}]  }
   0x1   :  { %10 = vsyncpa [#allocation4 + $0x1], 0 }
   0x2   :  { %11 = vsyncpa [#allocation5], 0 }
   0x3   :  { %13 = vsyncpa [#allocation5 + $0x1], 0  ;;  %s1282_s12 = smov 0   ;;  %s1284_s13 = smov 0  }
   0x4   :  { %s1286_s14 = smov 0   ;;  %s1288_s15 = smov 0  }
   0x5 LB: > { %s1303_s16 = sadd.s32 4294967295, %s1245_s15   ;;  %s929_s17 = sadd.s32 4294967294, %s1245_s15   ;;  %s1245_s15 = sphi %s1288_s15, %s1524_s15   ;;  %s1241_s14 = sphi %s1286_s14, %s1523_s14   ;;  %s1237_s13 = sphi %s1284_s13, %s1522_s13   ;;  %s1233_s12 = sphi %s1282_s12, %s1521_s12  }
   0x6   : > { %s1307_s18 = sadd.s32 1, %s1245_s15   ;;  %s26_s19 = sadd.s32 1, %s1241_s14 }
   0x7   : > { %s23_s20 = ssub.s32 %s1245_s15, %s1307_s18  ;;  %p33_p0 = scmp.ne.s32.totalorder %s1241_s14, %s1237_s13 }
   0x8   : > { %p24_p1 = scmp.eq.s32.totalorder %s23_s20, 0  ;;  %p34_p2 = scmp.eq.s32.totalorder %s1245_s15, 0 }
   0x9   : > { %p39_p3 = scmp.ne.s32.totalorder %s1237_s13, %s1233_s12  ;;  %p40_p4 = scmp.eq.s32.totalorder %s1303_s16, 0 }
   0xa   : > { %s1319_s21 = scalar_select %p24_p1, %s1241_s14, %s26_s19  }
   0xb   : > { %p1321_p5 = por %p34_p2, %p33_p0  ;;  %p1325_p6 = por %p40_p4, %p39_p3 }
   0xc   : > { %p105_p7 = scmp.eq.s32.totalorder %s1303_s16, 1  ;;  %p111_p8 = scmp.eq.s32.totalorder %s929_s17, 1 }
   0xd   : > { %p1093_p10 = scmp.lt.s32.totalorder %s1245_s15, 2  ;;  %s137_s26 = sand.u32 1, %s1241_s14  }
   0xe   : > { %p1332_p11 = por %p105_p7, %p33_p0  ;;  %p1336_p12 = por %p111_p8, %p39_p3 }
   0xf   : > { %s1051_s27 = sshll.u32 %s1245_s15, 5  ;;  %s932_s28 = sshll.u32 %s137_s26, 5 }
  0x10   : > { %s146_s4 = scalar_lea.hbm %s1511_s0, %s1051_s27  ;;  %s141_s6 = scalar_lea.vmem [#allocation3], %s932_s28 }
  0x11   : > { %s147_s5 = sshll.u32 %s146_s4, 4  ;;  %s149_s7 = sshll.u32 %s141_s6, 4  ;;  %s148_s5 = int_to_ptr.hbm [resolvable:$true] %s147_s5  ;;  %s150_s7 = int_to_ptr.vmem [resolvable:$true] %s149_s7 }
  0x12   : > { %p1347_p13 = pnand %p1093_p10, %p1321_p5  ;;  %p935_p0 = scmp.ge.s32.totalorder %s1245_s15, 1 }
  0x13   : > { %p157_p1 = scmp.lt.s32.totalorder %s1245_s15, 3  ;;  %s138_s9 = scalar_lea.sflag [#allocation4], %s137_s26 }
  0x14   : > { %s1149_s10 = sshra.s32 %s148_s5, 4  ;;  %p1153_p3 = pneg %p1347_p13  ;;  %s1150_s10 = int_to_ptr.hbm [resolvable:$true] %s1149_s10 }
  0x15   : > { %s1151_s11 = scalar_lea.hbm %s1150_s10, 32  ;;  %s1156_s20 = scalar_lea.hbm %s1511_s0, 64 }
  0x16   : > { %p1152_p2 = scmp.ne.s32.totalorder %s1150_s10, %s1151_s11  ;;  %p1157_p5 = scmp.lt.s32.totalorder %s1150_s10, %s1511_s0 }
  0x17   : > { %p1158_p8 = scmp.lt.s32.totalorder %s1156_s20, %s1151_s11 }
  0x18   : > { %p1154_p4 = pnand %p1153_p3, %p1152_p2 }
  0x19   : > { %p1159_p10 = por %p1158_p8, %p1157_p5 }
  0x1a   : > { %p1155_p7 = pneg %p1154_p4 }
  0x1c   : > { %p1160_p9 = pnand %p1159_p10, %p1155_p7 }
  0x1e   : > { %1163 = shalt.err (!%p1160_p9)
}
  0x1f   : > { %s1247_s26 = smov 256   ;;  %s1248_s28 = smov 16  }
  0x20   : > { %1088 = dma.hbm_to_vmem [thread:$0]  (!%p1347_p13), %s148_s5, 512, %s150_s7, %s138_s9, %s1247_s26, %s1247_s26, %s1248_s28  }
  0x21   : > { %p158_p2 = pnand %p935_p0, %p157_p1 }
  0x22   : > { %s1368_s29 = sand.u32 (!%p158_p2), 1, %s1237_s13  }
  0x23   : > { %161 = sbr.rel (%p158_p2) target bundleno = 781 (0x30d), region = 32  ;;  %s936_s30 = sshll.u32 (!%p158_p2), %s1368_s29, 5 }
  0x24   : > { %s164_s4 = scalar_lea.sflag (!%p158_p2), [#allocation4], %s1368_s29  ;;  %s1372_s6 = scalar_lea.vmem (!%p158_p2), [#allocation3], %s936_s30 }
  0x28   : > { %1224 = dma.done.wait (%p1325_p6), %s164_s4, 512  }
  0x29   : > { %1226 = vsyncadd (%p1325_p6), %s164_s4, 4294966784  ;;  %v413_v0 = vld [vmem:[%s1372_s6 + $0x10] sm:$0xff]  ;;  %v411_v1 = vld [vmem:[%s1372_s6] sm:$0xff]  ;;  %s1249_s5 = smov 91   ;;  %s1250_s7 = smov 92   ;;  %vm220_vm0 = vcmask 1043456  }
  0x2a   : > { %423 = vrot.lane.b32.xlu1 %v413_v0, %s1249_s5  ;;  %419 = vrot.lane.b32.xlu0 %v411_v1, %s1249_s5  ;;  %196 = vst [vmem:[#allocation2] sm:$0xff] %v411_v1  ;;  %v414_v2 = vld [vmem:[%s1372_s6 + $0x18] sm:$0xff]  ;;  %v412_v3 = vld [vmem:[%s1372_s6 + $0x8] sm:$0xff]  ;;  %s1251_s23 = smov 108   ;;  %s1252_s8 = smov 109   ;;  %vm397_vm1 = vcmask 752640  }
  0x2b   : > { %384 = vrot.lane.b32.xlu2 %v411_v1, %s1250_s7  ;;  %198 = vst [vmem:[#allocation2 + $0xc] sm:$0xff] %v413_v0  ;;  %s1253_s9 = smov 90   ;;  %s1254_s10 = smov 110   ;;  %vm362_vm2 = vcmask 883712   ;;  %vm432_vm3 = vcmask 744448   ;;  %vm467_vm4 = vcmask 736256  }
  0x2c   : > { %s1255_s11 = smov 126   ;;  %s1256_s17 = smov 127   ;;  %vm327_vm5 = vcmask 891904   ;;  %vm292_vm6 = vcmask 900096   ;;  %vm222_vm7 = vcmask 1039360   ;;  %vm668_vm8 = vcmask 130048  }
  0x2d   : > { %vm257_vm9 = vcmask 1031168   ;;  %s1260_s26 = smov 1   ;;  %s1079_s28 = smul.u32 24, %s1368_s29 }
  0x2e   : > { %s1080_s30 = smul.u32 24, %s1303_s16  ;;  %s843_s16 = scalar_lea.sflag [#allocation5], %s1368_s29 }
  0x2f   : > { %s1199_s19 = scalar_lea.hbm %s1514_s3, 48 }
  0x32   : > { %425 = vrot.lane.b32.xlu1 %v414_v2, %s1249_s5  ;;  %421 = vrot.lane.b32.xlu0 %v412_v3, %s1249_s5  ;;  %s854_s5 = scalar_lea.hbm %s1514_s3, %s1080_s30 }
  0x33   : > { %386 = vrot.lane.b32.xlu2 %v412_v3, %s1250_s7 }
  0x3a   : > { %390 = vrot.lane.b32.xlu1 %v414_v2, %s1250_s7  ;;  %388 = vrot.lane.b32.xlu0 %v413_v0, %s1250_s7  ;;  %s190_s7 = scalar_lea.vmem [#allocation6], %s1079_s28 }
  0x3b   : > { %349 = vrot.lane.b32.xlu2 %v411_v1, %s1251_s23 }
  0x42   : > { %353 = vrot.lane.b32.xlu1 %v413_v0, %s1251_s23  ;;  %351 = vrot.lane.b32.xlu0 %v412_v3, %s1251_s23 }
  0x43   : > { %355 = vrot.lane.b32.xlu2 %v414_v2, %s1251_s23  ;;  %s856_s23 = sshll.u32 %s190_s7, 4  ;;  %s857_s23 = int_to_ptr.vmem [resolvable:$true] %s856_s23 }
  0x4a   : > { %316 = vrot.lane.b32.xlu1 %v412_v3, %s1252_s8  ;;  %314 = vrot.lane.b32.xlu0 %v411_v1, %s1252_s8 }
  0x4b   : > { %318 = vrot.lane.b32.xlu2 %v413_v0, %s1252_s8 }
  0x52   : > { %454 = vrot.lane.b32.xlu1 %v411_v1, %s1253_s9  ;;  %320 = vrot.lane.b32.xlu0 %v414_v2, %s1252_s8  ;;  %s858_s8 = sshll.u32 %s854_s5, 4  ;;  %s859_s8 = int_to_ptr.hbm [resolvable:$true] %s858_s8 }
  0x53   : > { %456 = vrot.lane.b32.xlu2 %v412_v3, %s1253_s9 }
  0x5a   : > { %460 = vrot.lane.b32.xlu1 %v414_v2, %s1253_s9  ;;  %458 = vrot.lane.b32.xlu0 %v413_v0, %s1253_s9  ;;  %s1193_s9 = sshra.s32 %s859_s8, 4  ;;  %s1194_s9 = int_to_ptr.hbm [resolvable:$true] %s1193_s9 }
  0x5b   : > { %279 = vrot.lane.b32.xlu2 %v411_v1, %s1254_s10  ;;  %p1200_p0 = scmp.lt.s32.totalorder %s1194_s9, %s1514_s3 }
  0x62   : > { %283 = vrot.lane.b32.xlu1 %v413_v0, %s1254_s10  ;;  %281 = vrot.lane.b32.xlu0 %v412_v3, %s1254_s10 }
  0x63   : > { %285 = vrot.lane.b32.xlu2 %v414_v2, %s1254_s10  ;;  %s1195_s10 = scalar_lea.hbm %s1194_s9, 24 }
  0x64   : > { %p1196_p6 = scmp.ne.s32.totalorder %s1194_s9, %s1195_s10  ;;  %p1201_p1 = scmp.lt.s32.totalorder %s1199_s19, %s1195_s10 }
  0x66   : > { %p1197_p9 = pnand %p1196_p6, %p1332_p11  ;;  %p1202_p3 = por %p1201_p1, %p1200_p0 }
  0x68   : > { %p1198_p13 = pneg %p1197_p9 }
  0x6a   : > { %246 = vrot.lane.b32.xlu1 %v412_v3, %s1255_s11  ;;  %244 = vrot.lane.b32.xlu0 %v411_v1, %s1255_s11  ;;  %p1203_p4 = pnand %p1202_p3, %p1198_p13 }
  0x6b   : > { %248 = vrot.lane.b32.xlu2 %v413_v0, %s1255_s11 }
  0x72   : > { %250 = vrot.lane.b32.xlu0 %v414_v2, %s1255_s11  ;;  %208 = vrot.lane.b32.xlu1 %v411_v1, %s1256_s17 }
  0x73   : > { %210 = vrot.lane.b32.xlu2 %v412_v3, %s1256_s17 }
  0x7a   : > { %212 = vrot.lane.b32.xlu0 %v413_v0, %s1256_s17  ;;  %214 = vrot.lane.b32.xlu1 %v414_v2, %s1256_s17 }
  0x85   : > { %v385_v4 = vpop.permute.xlu2 %384 }
  0x86   : > { %v392_v5 = vrot.slane %v385_v4, 4 }
  0x8d   : > { %v387_v6 = vpop.permute.xlu2 %386 }
  0x8e   : > { %v393_v7 = vrot.slane %v387_v6, 4 }
  0x90   : > { %v396_v8 = vsel %vm220_vm0, %v392_v5, %v393_v7  ;;  %v399_v9 = vsel %vm397_vm1, %v387_v6, %v393_v7 }
  0x91   : > { %v398_v10 = vsel %vm397_vm1, %v385_v4, %v396_v8  ;;  %408 = vst [vmem:[#allocation2 + $0x98] sm:$0xf] %v399_v9 }
  0x92   : > { %407 = vst [vmem:[#allocation2 + $0x90] sm:$0xff] %v398_v10 }
  0x95   : > { %v350_v11 = vpop.permute.xlu2 %349 }
  0x96   : > { %v357_v46 = vrot.slane %v350_v11, 4 }
  0x99   : > { %v1011_v55 = vld [vmem:[#allocation2 + $0x90] sm:$0xf]  ;;  %v1070_v56 = vld [vmem:[#allocation2 + $0x94] sm:$0xf] }
  0x9c   : > { %v424_v12 = vpop.permute.xlu1 %423  ;;  %v420_v13 = vpop.permute.xlu0 %419 }
  0x9d   : > { %v356_v14 = vpop.permute.xlu2 %355  ;;  %v429_v19 = vrot.slane %v424_v12, 4  ;;  %v427_v20 = vrot.slane %v420_v13, 4 }
  0x9e   : > { %v360_v15 = vrot.slane %v356_v14, 4 }
  0xa0   : > { %v367_v16 = vsel %vm362_vm2, %v356_v14, %v360_v15 }
  0xa1   : > { %375 = vst [vmem:[#allocation2 + $0x8c] sm:$0xf] %v367_v16 }
  0xa4   : > { %v426_v17 = vpop.permute.xlu1 %425  ;;  %v422_v18 = vpop.permute.xlu0 %421 }
  0xa5   : > { %v430_v21 = vrot.slane %v426_v17, 4  ;;  %v428_v22 = vrot.slane %v422_v18, 4  ;;  %v1386_v23 = vpop.permute.xlu2 %318 }
  0xa7   : > { %v435_v24 = vsel %vm220_vm0, %v429_v19, %v430_v21  ;;  %v437_v25 = vsel %vm432_vm3, %v426_v17, %v430_v21  ;;  %v431_v26 = vsel %vm220_vm0, %v427_v20, %v428_v22  ;;  %v434_v29 = vsel %vm432_vm3, %v422_v18, %v428_v22 }
  0xa8   : > { %v436_v27 = vsel %vm432_vm3, %v424_v12, %v435_v24  ;;  %445 = vst [vmem:[#allocation2 + $0xbc] sm:$0xf] %v437_v25  ;;  %v433_v28 = vsel %vm432_vm3, %v420_v13, %v431_v26 }
  0xa9   : > { %444 = vst [vmem:[#allocation2 + $0xb4] sm:$0xff] %v436_v27 }
  0xaa   : > { %442 = vst [vmem:[#allocation2 + $0xa8] sm:$0xff] %v433_v28 }
  0xab   : > { %443 = vst [vmem:[#allocation2 + $0xb0] sm:$0xf] %v434_v29 }
  0xac   : > { %v391_v30 = vpop.permute.xlu1 %390  ;;  %v389_v31 = vpop.permute.xlu0 %388 }
  0xad   : > { %v395_v32 = vrot.slane %v391_v30, 4  ;;  %v394_v33 = vrot.slane %v389_v31, 4  ;;  %v1390_v34 = vpop.permute.xlu2 %456 }
  0xae   : > { %v463_v35 = vrot.slane %v1390_v34, 4 }
  0xaf   : > { %v402_v36 = vsel %vm397_vm1, %v391_v30, %v395_v32  ;;  %v400_v37 = vsel %vm220_vm0, %v394_v33, %v395_v32 }
  0xb0   : > { %410 = vst [vmem:[#allocation2 + $0xa4] sm:$0xf] %v402_v36  ;;  %v401_v38 = vsel %vm397_vm1, %v389_v31, %v400_v37  ;;  %v1074_v39 = vld [vmem:[#allocation2 + $0xb0] sm:$0xf0]  ;;  %v1025_v40 = vld [vmem:[#allocation2 + $0xb4] sm:$0xf0]  ;;  %v469_v41 = vsel %vm467_vm4, %v1390_v34, %v463_v35 }
  0xb1   : > { %409 = vst [vmem:[#allocation2 + $0x9c] sm:$0xff] %v401_v38  ;;  %v1023_v42 = vld [vmem:[#allocation2 + $0xa8] sm:$0xf]  ;;  %v1073_v43 = vld [vmem:[#allocation2 + $0xac] sm:$0xf] }
  0xb2   : > { %v1024_v44 = vor.u32 %v1074_v39, %v1023_v42  ;;  %v1028_v45 = vor.u32 %v1073_v43, %v1025_v40  ;;  %478 = vst [vmem:[#allocation2 + $0xc8] sm:$0xf] %v469_v41  ;;  %v1442_v43 = vld [vmem:[%s1512_s1] sm:$0xff] }
  0xb4   : > { %672 = vmatpush.bf16.msra.mxu0 %v1024_v44  ;;  %698 = vmatpush.bf16.msra.mxu2 %v1028_v45  ;;  %v354_v47 = vpop.permute.xlu1 %353  ;;  %v352_v48 = vpop.permute.xlu0 %351 }
  0xb5   : > { %v359_v49 = vrot.slane %v354_v47, 4  ;;  %v358_v50 = vrot.slane %v352_v48, 4  ;;  %v1400_v51 = vpop.permute.xlu2 %279 }
  0xb6   : > { %v287_v42 = vrot.slane %v1400_v51, 4 }
  0xb7   : > { %v361_v52 = vsel %vm220_vm0, %v357_v46, %v358_v50  ;;  %v364_v53 = vsel %vm362_vm2, %v352_v48, %v358_v50  ;;  %v365_v54 = vsel %vm220_vm0, %v359_v49, %v360_v15  ;;  %v324_v15 = vrot.slane %v1386_v23, 4  ;;  %v1031_v49 = vld [vmem:[#allocation2 + $0xb0] sm:$0xf]  ;;  %v1075_v50 = vld [vmem:[#allocation2 + $0xb8] sm:$0xf0] }
  0xb8   : > { %v363_v57 = vsel %vm362_vm2, %v350_v11, %v361_v52  ;;  %373 = vst [vmem:[#allocation2 + $0x80] sm:$0xf] %v364_v53  ;;  %v366_v58 = vsel %vm362_vm2, %v354_v47, %v365_v54  ;;  %v1071_v59 = vld [vmem:[#allocation2 + $0x98] sm:$0xf0]  ;;  %v1013_v60 = vld [vmem:[#allocation2 + $0x9c] sm:$0xf0]  ;;  %v520_v52 = vunpack.c.h.b16 %v1442_v43 }
  0xb9   : > { %372 = vst [vmem:[#allocation2 + $0x78] sm:$0xff] %v363_v57  ;;  %v1012_v61 = vor.u32 %v1071_v59, %v1011_v55  ;;  %v1016_v62 = vor.u32 %v1070_v56, %v1013_v60 }
  0xba   : > { %374 = vst [vmem:[#allocation2 + $0x84] sm:$0xff] %v366_v58  ;;  %v193_v58 = vld [vmem:[%s1372_s6 + $0x8] sm:$0xf] }
  0xbb   : > { %673 = vmatpush.bf16.msra.mxu0 %v1012_v61  ;;  %699 = vmatpush.bf16.msra.mxu2 %v1016_v62  ;;  %197 = vst [vmem:[#allocation2 + $0x8] sm:$0xf] %v193_v58 }
  0xbc   : > { %v317_v63 = vpop.permute.xlu1 %316  ;;  %v315_v0 = vpop.permute.xlu0 %314 }
  0xbd   : > { %v323_v1 = vrot.slane %v317_v63, 4  ;;  %v322_v2 = vrot.slane %v315_v0, 4  ;;  %v1407_v3 = vpop.permute.xlu2 %285 }
  0xbe   : > { %v290_v4 = vrot.slane %v1407_v3, 4 }
  0xbf   : > { %v329_v5 = vsel %vm327_vm5, %v317_v63, %v323_v1  ;;  %v326_v6 = vsel %vm220_vm0, %v322_v2, %v323_v1  ;;  %v1043_v1 = vld [vmem:[#allocation2 + $0xc8] sm:$0xf]  ;;  %v195_v2 = vld [vmem:[%s1372_s6 + $0x18] sm:$0xf] }
  0xc0   : > { %338 = vst [vmem:[#allocation2 + $0x68] sm:$0xf] %v329_v5  ;;  %v328_v7 = vsel %vm327_vm5, %v315_v0, %v326_v6  ;;  %v999_v8 = vld [vmem:[#allocation2 + $0x78] sm:$0xf]  ;;  %v1067_v9 = vld [vmem:[#allocation2 + $0x7c] sm:$0xf]  ;;  %v297_v10 = vsel %vm292_vm6, %v1407_v3, %v290_v4  ;;  %v1032_v3 = vor.u32 %v1075_v50, %v1031_v49 }
  0xc1   : > { %337 = vst [vmem:[#allocation2 + $0x60] sm:$0xff] %v328_v7  ;;  %v1068_v11 = vld [vmem:[#allocation2 + $0x80] sm:$0xf0]  ;;  %v1001_v12 = vld [vmem:[#allocation2 + $0x84] sm:$0xf0] }
  0xc2   : > { %v1000_v13 = vor.u32 %v1068_v11, %v999_v8  ;;  %v1004_v14 = vor.u32 %v1067_v9, %v1001_v12  ;;  %305 = vst [vmem:[#allocation2 + $0x5c] sm:$0xf] %v297_v10  ;;  %v1072_v6 = vld [vmem:[#allocation2 + $0xa0] sm:$0xf0]  ;;  %v1019_v10 = vld [vmem:[#allocation2 + $0x98] sm:$0xf] }
  0xc3   : > { %199 = vst [vmem:[#allocation2 + $0x14] sm:$0xf] %v195_v2  ;;  %v1020_v11 = vor.u32 %v1072_v6, %v1019_v10 }
  0xc4   : > { %674 = vmatpush.bf16.msra.mxu0 %v1000_v13  ;;  %700 = vmatpush.bf16.msra.mxu2 %v1004_v14  ;;  %v455_v16 = vpop.permute.xlu1 %454  ;;  %v321_v17 = vpop.permute.xlu0 %320  ;;  %v1007_v14 = vld [vmem:[#allocation2 + $0x80] sm:$0xf] }
  0xc5   : > { %v462_v18 = vrot.slane %v455_v16, 4  ;;  %v325_v19 = vrot.slane %v321_v17, 4  ;;  %v1418_v20 = vpop.permute.xlu2 %248 }
  0xc7   : > { %v466_v21 = vsel %vm220_vm0, %v462_v18, %v463_v35  ;;  %v330_v22 = vsel %vm220_vm0, %v324_v15, %v325_v19  ;;  %v332_v24 = vsel %vm327_vm5, %v321_v17, %v325_v19  ;;  %v1069_v15 = vld [vmem:[#allocation2 + $0x88] sm:$0xf0] }
  0xc8   : > { %v468_v25 = vsel %vm467_vm4, %v455_v16, %v466_v21  ;;  %v331_v26 = vsel %vm327_vm5, %v1386_v23, %v330_v22  ;;  %340 = vst [vmem:[#allocation2 + $0x74] sm:$0xf] %v332_v24  ;;  %v987_v23 = vld [vmem:[#allocation2 + $0x60] sm:$0xf]  ;;  %v1064_v36 = vld [vmem:[#allocation2 + $0x64] sm:$0xf] }
  0xc9   : > { %477 = vst [vmem:[#allocation2 + $0xc0] sm:$0xff] %v468_v25  ;;  %v254_v25 = vrot.slane %v1418_v20, 4 }
  0xca   : > { %339 = vst [vmem:[#allocation2 + $0x6c] sm:$0xff] %v331_v26  ;;  %v1008_v26 = vor.u32 %v1069_v15, %v1007_v14  ;;  %v1054_v2 = vld [vmem:[#allocation2 + $0x10] sm:$0xf0] }
  0xcc   : > { %v461_v27 = vpop.permute.xlu1 %460  ;;  %v459_v28 = vpop.permute.xlu0 %458 }
  0xcd   : > { %v465_v29 = vrot.slane %v461_v27, 4  ;;  %v464_v30 = vrot.slane %v459_v28, 4  ;;  %v1428_v31 = vpop.permute.xlu2 %210 }
  0xce   : > { %v217_v32 = vrot.slane %v1428_v31, 4 }
  0xcf   : > { %v472_v33 = vsel %vm467_vm4, %v461_v27, %v465_v29  ;;  %v470_v34 = vsel %vm220_vm0, %v464_v30, %v465_v29  ;;  %v1066_v29 = vld [vmem:[#allocation2 + $0x70] sm:$0xf0] }
  0xd0   : > { %480 = vst [vmem:[#allocation2 + $0xd4] sm:$0xf] %v472_v33  ;;  %v471_v35 = vsel %vm467_vm4, %v459_v28, %v470_v34  ;;  %v224_v37 = vsel %vm222_vm7, %v1428_v31, %v217_v32  ;;  %v1035_v48 = vld [vmem:[#allocation2 + $0xc0] sm:$0xf]  ;;  %v1076_v56 = vld [vmem:[#allocation2 + $0xc4] sm:$0xf] }
  0xd1   : > { %479 = vst [vmem:[#allocation2 + $0xcc] sm:$0xff] %v471_v35  ;;  %v1065_v38 = vld [vmem:[#allocation2 + $0x68] sm:$0xf0]  ;;  %v989_v39 = vld [vmem:[#allocation2 + $0x6c] sm:$0xf0] }
  0xd2   : > { %v988_v40 = vor.u32 %v1065_v38, %v987_v23  ;;  %v992_v41 = vor.u32 %v1064_v36, %v989_v39  ;;  %233 = vst [vmem:[#allocation2 + $0x20] sm:$0xf] %v224_v37  ;;  %v995_v34 = vld [vmem:[#allocation2 + $0x68] sm:$0xf] }
  0xd3   : > { %v996_v37 = vor.u32 %v1066_v29, %v995_v34 }
  0xd4   : > { %675 = vmatpush.bf16.msra.mxu0 %v988_v40  ;;  %701 = vmatpush.bf16.msra.mxu2 %v992_v41  ;;  %v284_v44 = vpop.permute.xlu1 %283  ;;  %v282_v45 = vpop.permute.xlu0 %281  ;;  %v1063_v41 = vld [vmem:[#allocation2 + $0x58] sm:$0xf0] }
  0xd5   : > { %v289_v46 = vrot.slane %v284_v44, 4  ;;  %v288_v47 = vrot.slane %v282_v45, 4 }
  0xd7   : > { %v291_v53 = vsel %vm220_vm0, %v287_v42, %v288_v47  ;;  %v294_v54 = vsel %vm292_vm6, %v282_v45, %v288_v47  ;;  %v295_v55 = vsel %vm220_vm0, %v289_v46, %v290_v4  ;;  %v1078_v57 = vld [vmem:[#allocation2 + $0xd0] sm:$0xf0]  ;;  %v522_v4 = vpack.c.b16 %v520_v52, %v520_v52 }
  0xd8   : > { %v293_v59 = vsel %vm292_vm6, %v1400_v51, %v291_v53  ;;  %303 = vst [vmem:[#allocation2 + $0x50] sm:$0xf] %v294_v54  ;;  %v296_v60 = vsel %vm292_vm6, %v284_v44, %v295_v55  ;;  %v1077_v61 = vld [vmem:[#allocation2 + $0xc8] sm:$0xf0]  ;;  %v1037_v62 = vld [vmem:[#allocation2 + $0xcc] sm:$0xf0]  ;;  %v1044_v5 = vor.u32 %v1078_v57, %v1043_v1 }
  0xd9   : > { %302 = vst [vmem:[#allocation2 + $0x48] sm:$0xff] %v293_v59  ;;  %v1036_v63 = vor.u32 %v1077_v61, %v1035_v48  ;;  %v1040_v0 = vor.u32 %v1076_v56, %v1037_v62  ;;  %v959_v58 = vld [vmem:[#allocation2 + $0x20] sm:$0xf]  ;;  %v1052_v61 = vld [vmem:[#allocation2 + $0x4] sm:$0xf] }
  0xda   : > { %304 = vst [vmem:[#allocation2 + $0x54] sm:$0xff] %v296_v60  ;;  %v939_v59 = vld [vmem:[#allocation2] sm:$0xf]  ;;  %v1053_v60 = vld [vmem:[#allocation2 + $0x8] sm:$0xf0] }
  0xdb   : > { %692 = vmatpush.bf16.msra.mxu1 %v1036_v63  ;;  %718 = vmatpush.bf16.msra.mxu3 %v1040_v0  ;;  %v941_v62 = vld [vmem:[#allocation2 + $0xc] sm:$0xf0]  ;;  %v947_v63 = vld [vmem:[#allocation2 + $0x8] sm:$0xf]  ;;  %v940_v10 = vor.u32 %v1053_v60, %v939_v59 }
  0xdc   : > { %v247_v51 = vpop.permute.xlu1 %246  ;;  %v245_v7 = vpop.permute.xlu0 %244 }
  0xdd   : > { %v253_v8 = vrot.slane %v247_v51, 4  ;;  %v252_v9 = vrot.slane %v245_v7, 4 }
  0xde   : > { %1046 = vmatmul.msk.bf16.vlgmr.msra.gmra.mxu3 %vm668_vm8, %v522_v4  ;;  %1045 = vmatmul.msk.bf16.vlgmr.msra.gmra.mxu1 %vm668_vm8, %v522_v4 }
  0xdf   : > { %724 = vmatpush.bf16.msrb.mxu1 %v1032_v3  ;;  %744 = vmatpush.bf16.msrb.mxu3 %v1044_v5  ;;  %v259_v12 = vsel %vm257_vm9, %v247_v51, %v253_v8  ;;  %v256_v13 = vsel %vm220_vm0, %v252_v9, %v253_v8  ;;  %v983_v40 = vld [vmem:[#allocation2 + $0x50] sm:$0xf]  ;;  %v519_v8 = vunpack.c.l.b16 %v1442_v43  ;;  %v948_v9 = vor.u32 %v1054_v2, %v947_v63 }
  0xe0   : > { %268 = vst [vmem:[#allocation2 + $0x38] sm:$0xf] %v259_v12  ;;  %v258_v16 = vsel %vm257_vm9, %v245_v7, %v256_v13  ;;  %v975_v17 = vld [vmem:[#allocation2 + $0x48] sm:$0xf]  ;;  %v1061_v18 = vld [vmem:[#allocation2 + $0x4c] sm:$0xf]  ;;  %v984_v42 = vor.u32 %v1063_v41, %v983_v40  ;;  %v750_v43 = vlaneseq }
  0xe1   : > { %267 = vst [vmem:[#allocation2 + $0x30] sm:$0xff] %v258_v16  ;;  %v1062_v19 = vld [vmem:[#allocation2 + $0x50] sm:$0xf0]  ;;  %v977_v21 = vld [vmem:[#allocation2 + $0x54] sm:$0xf0]  ;;  %v521_v12 = vpack.c.b16 %v519_v8, %v519_v8  ;;  %v1257_v13 = vmov 18.0  }
  0xe2   : > { %v976_v22 = vor.u32 %v1062_v19, %v975_v17  ;;  %v980_v24 = vor.u32 %v1061_v18, %v977_v21  ;;  %1145 = vrcp.f32 %v1257_v13 }
  0xe3   : > { %725 = vmatpush.bf16.msrb.mxu1 %v1020_v11  ;;  %v944_v11 = vor.u32 %v1052_v61, %v941_v62 }
  0xe4   : > { %676 = vmatpush.bf16.msra.mxu0 %v976_v22  ;;  %702 = vmatpush.bf16.msra.mxu2 %v980_v24  ;;  %v251_v27 = vpop.permute.xlu0 %250  ;;  %v209_v28 = vpop.permute.xlu1 %208  ;;  %v751_v22 = vand.u32 127, %v750_v43 }
  0xe5   : > { %v255_v30 = vrot.slane %v251_v27, 4  ;;  %v216_v33 = vrot.slane %v209_v28, 4 }
  0xe7   : > { %726 = vmatpush.bf16.msrb.mxu1 %v1008_v26  ;;  %v260_v35 = vsel %vm220_vm0, %v254_v25, %v255_v30  ;;  %v262_v23 = vsel %vm257_vm9, %v251_v27, %v255_v30  ;;  %v221_v36 = vsel %vm220_vm0, %v216_v33, %v217_v32  ;;  %v971_v47 = vld [vmem:[#allocation2 + $0x38] sm:$0xf]  ;;  %v752_v25 = vadd.s32 128, %v751_v22 }
  0xe8   : > { %v261_v38 = vsel %vm257_vm9, %v1418_v20, %v260_v35  ;;  %270 = vst [vmem:[#allocation2 + $0x44] sm:$0xf] %v262_v23  ;;  %v223_v39 = vsel %vm222_vm7, %v209_v28, %v221_v36  ;;  %v963_v49 = vld [vmem:[#allocation2 + $0x30] sm:$0xf]  ;;  %v1058_v50 = vld [vmem:[#allocation2 + $0x34] sm:$0xf]  ;;  %v1146_v14 = vpop.eup %1145  ;;  %v754_v28 = vcvt.s32.f32 %v751_v22 }
  0xe9   : > { %269 = vst [vmem:[#allocation2 + $0x3c] sm:$0xff] %v261_v38  ;;  %v758_v15 = vmul.f32 18.0, %v1146_v14  ;;  %vm762_vm10 = vweird.f32 %v1146_v14  ;;  %v753_v26 = vadd.s32 256, %v751_v22  ;;  %v755_v30 = vcvt.s32.f32 %v752_v25 }
  0xea   : > { %232 = vst [vmem:[#allocation2 + $0x18] sm:$0xff] %v223_v39  ;;  %vm776_vm11 = vcmp.lt.f32.partialorder %v754_v28, 288.0 }
  0xeb   : > { %727 = vmatpush.bf16.msrb.mxu1 %v996_v37  ;;  %v759_v17 = vsub.f32 1.0, %v758_v15  ;;  %v756_v33 = vcvt.s32.f32 %v753_v26  ;;  %vm777_vm13 = vcmp.lt.f32.partialorder %v755_v30, 288.0 }
  0xec   : > { %v213_v44 = vpop.permute.xlu0 %212  ;;  %v215_v45 = vpop.permute.xlu1 %214 }
  0xed   : > { %v218_v46 = vrot.slane %v213_v44, 4  ;;  %v219_v31 = vrot.slane %v215_v45, 4  ;;  %v760_v19 = vmul.f32 %v1146_v14, %v759_v17  ;;  %vm778_vm15 = vcmp.lt.f32.partialorder %v756_v33, 288.0 }
  0xee   : > { %1047 = vmatmul.msk.bf16.vlgmr.msrb.gmra.mxu3 %vm668_vm8, %v522_v4 }
  0xef   : > { %728 = vmatpush.bf16.msrb.mxu1 %v984_v42  ;;  %v225_v32 = vsel %vm220_vm0, %v218_v46, %v219_v31  ;;  %v227_v20 = vsel %vm222_vm7, %v215_v45, %v219_v31  ;;  %v1060_v48 = vld [vmem:[#allocation2 + $0x40] sm:$0xf0]  ;;  %v761_v24 = vadd.f32 %v1146_v14, %v760_v19  ;;  %v1261_v19 = vmov 1  }
  0xf0   : > { %v226_v52 = vsel %vm222_vm7, %v213_v44, %v225_v32  ;;  %235 = vst [vmem:[#allocation2 + $0x2c] sm:$0xf] %v227_v20  ;;  %v972_v53 = vor.u32 %v1060_v48, %v971_v47  ;;  %v1059_v54 = vld [vmem:[#allocation2 + $0x38] sm:$0xf0]  ;;  %v965_v55 = vld [vmem:[#allocation2 + $0x3c] sm:$0xf0]  ;;  %1144 = vset.pattern.permute.xlu0 %v1261_v19 }
  0xf1   : > { %234 = vst [vmem:[#allocation2 + $0x24] sm:$0xff] %v226_v52  ;;  %v964_v56 = vor.u32 %v1059_v54, %v963_v49  ;;  %v968_v57 = vor.u32 %v1058_v50, %v965_v55  ;;  %v951_v1 = vld [vmem:[#allocation2 + $0x18] sm:$0xf]  ;;  %v1055_v4 = vld [vmem:[#allocation2 + $0x1c] sm:$0xf]  ;;  %v763_v29 = vsel %vm762_vm10, %v1146_v14, %v761_v24  ;;  %v1258_v48 = vmov 0.0  }
  0xf2   : > { %v764_v34 = vmul.f32 %v763_v29, %v754_v28  ;;  %v765_v35 = vmul.f32 %v763_v29, %v755_v30  ;;  %v766_v23 = vmul.f32 %v763_v29, %v756_v33 }
  0xf3   : > { %729 = vmatpush.bf16.msrb.mxu1 %v972_v53  ;;  %677 = vmatpush.bf16.msra.mxu0 %v964_v56 }
  0xf4   : > { %703 = vmatpush.bf16.msra.mxu2 %v968_v57  ;;  %v767_v36 = vfloor.f32 %v764_v34  ;;  %v768_v38 = vfloor.f32 %v765_v35  ;;  %v769_v39 = vfloor.f32 %v766_v23 }
  0xf6   : > { %v770_v40 = vmul.f32 18.0, %v767_v36  ;;  %v771_v41 = vmul.f32 18.0, %v768_v38  ;;  %v772_v42 = vmul.f32 18.0, %v769_v39 }
  0xf7   : > { %v1057_v0 = vld [vmem:[#allocation2 + $0x28] sm:$0xf0] }
  0xf8   : > { %v960_v3 = vor.u32 %v1057_v0, %v959_v58  ;;  %v1056_v5 = vld [vmem:[#allocation2 + $0x20] sm:$0xf0]  ;;  %v953_v6 = vld [vmem:[#allocation2 + $0x24] sm:$0xf0]  ;;  %v773_v44 = vsub.f32 %v754_v28, %v770_v40  ;;  %v774_v46 = vsub.f32 %v755_v30, %v771_v41  ;;  %v775_v31 = vsub.f32 %v756_v33, %v772_v42 }
  0xf9   : > { %v952_v51 = vor.u32 %v1056_v5, %v951_v1  ;;  %v956_v7 = vor.u32 %v1055_v4, %v953_v6  ;;  %v1259_v4 = vmov 0  }
  0xfa   : > { %730 = vmatpush.bf16.msrb.mxu1 %v960_v3  ;;  %vm779_vm12 = vcmp.lt.f32.partialorder %v773_v44, 16.0  ;;  %vm780_vm14 = vcmp.lt.f32.partialorder %v774_v46, 16.0  ;;  %vm781_vm0 = vcmp.lt.f32.partialorder %v775_v31, 16.0  ;;  %1142 = vset.pattern.permute.xlu1 %v1259_v4 }
  0xfb   : > { %678 = vmatpush.bf16.msra.mxu0 %v952_v51  ;;  %704 = vmatpush.bf16.msra.mxu2 %v956_v7  ;;  %vm782_vm1 = vmand %vm776_vm11, %vm779_vm12 }
  0xfc   : > { %vm783_vm2 = vmand %vm777_vm13, %vm780_vm14  ;;  %v785_v49 = vsel %vm782_vm1, 0.00390625, %v1258_v48 }
  0xfd   : > { %vm784_vm3 = vmand %vm778_vm15, %vm781_vm0  ;;  %v786_v53 = vsel %vm783_vm2, 0.00390625, %v1258_v48 }
  0xfe   : > { %731 = vmatpush.bf16.msrb.mxu1 %v948_v9  ;;  %v787_v54 = vsel %vm784_vm3, 0.00390625, %v1258_v48 }
  0xff   : > { %679 = vmatpush.bf16.msra.mxu0 %v940_v10  ;;  %705 = vmatpush.bf16.msra.mxu2 %v944_v11 }
 0x101   : > { %732 = vmatmul.bf16.vlgmr.msrb.gmra.mxu1 %v521_v12 }
 0x102   : > { %680 = vmatmul.bf16.vlgmr.msra.gmra.mxu0 %v521_v12  ;;  %706 = vmatmul.bf16.vlgmr.msra.gmra.mxu2 %v521_v12 }
 0x15b   : > { %v694_v16 = vpop.f32.mrf.mxu1 }
 0x161   : > { %v720_v18 = vpop.f32.mrf.mxu3 }
 0x163   : > { %v696_v21 = vpop.f32.mrf.mxu1 }
 0x169   : > { %v722_v27 = vpop.f32.mrf.mxu3 }
 0x171   : > { %v746_v37 = vpop.f32.mrf.mxu3 }
 0x179   : > { %v748_v45 = vpop.f32.mrf.mxu3 }
 0x17e   : > { %v733_v47 = vpop.f32.mrf.mxu1 }
 0x17f   : > { %v681_v32 = vpop.f32.mrf.mxu0  ;;  %v747_v50 = vadd.f32 %v746_v37, %v733_v47 }
 0x180   : > { %v695_v20 = vadd.f32 %v694_v16, %v681_v32  ;;  %v804_v16 = vld [vmem:[%s1513_s2] sm:$0xff] }
 0x181   : > { %v790_v60 = vmul.f32 %v787_v54, %v747_v50 }
 0x182   : > { %v788_v55 = vmul.f32 %v785_v49, %v695_v20 }
 0x183   : > { %v797_v1 = vmul.f32 %v790_v60, %v747_v50 }
 0x184   : > { %v795_v61 = vmul.f32 %v788_v55, %v695_v20 }
 0x185   : > { %v707_v52 = vpop.f32.mrf.mxu2 }
 0x186   : > { %v721_v56 = vadd.f32 %v720_v18, %v707_v52  ;;  %v735_v57 = vpop.f32.mrf.mxu1 }
 0x187   : > { %v683_v58 = vpop.f32.mrf.mxu0 }
 0x188   : > { %v789_v59 = vmul.f32 %v786_v53, %v721_v56 }
 0x18a   : > { %v796_v62 = vmul.f32 %v789_v59, %v721_v56  ;;  %v791_v63 = vadd.f32 %v789_v59, %v788_v55 }
 0x18c   : > { %v792_v0 = vadd.f32 %v791_v63, %v790_v60  ;;  %v798_v2 = vadd.f32 %v796_v62, %v795_v61 }
 0x18d   : > { %v709_v3 = vpop.f32.mrf.mxu2 }
 0x18e   : > { %793 = vadd.xlane.f32.xlu2 %v792_v0  ;;  %v799_v5 = vadd.f32 %v798_v2, %v797_v1 }
 0x190   : > { %800 = vadd.xlane.f32.xlu0 %v799_v5 }
 0x201   : > { %v794_v6 = vpop.xlane.xlu2 %793 }
 0x202   : > { %v802_v51 = vmul.f32 %v794_v6, %v794_v6 }
 0x203   : > { %v801_v7 = vpop.xlane.xlu0 %800 }
 0x204   : > { %v803_v8 = vsub.f32 %v801_v7, %v802_v51 }
 0x206   : > { %v805_v9 = vadd.f32 1e-05, %v803_v8 }
 0x208   : > { %1147 = vrsqrt.f32 %v805_v9  ;;  %vm812_vm5 = vweird.f32 %v805_v9 }
 0x20e   : > { %v1148_v10 = vpop.eup %1147 }
 0x20f   : > { %v807_v11 = vmul.f32 %v1148_v10, %v805_v9  ;;  %vm813_vm4 = vweird.f32 %v1148_v10 }
 0x210   : > { %vm814_vm6 = vmor %vm812_vm5, %vm813_vm4 }
 0x211   : > { %v808_v12 = vmul.f32 %v1148_v10, %v807_v11 }
 0x213   : > { %v809_v13 = vmul.f32 0.5, %v808_v12 }
 0x215   : > { %v810_v14 = vsub.f32 1.5, %v809_v13 }
 0x217   : > { %v811_v15 = vmul.f32 %v1148_v10, %v810_v14 }
 0x219   : > { %v815_v17 = vsel %vm814_vm6, %v1148_v10, %v811_v15 }
 0x21a   : > { %v816_v43 = vmul.f32 %v815_v17, %v804_v16 }
 0x21c   : > { %v817_v18 = vmul.f32 %v816_v43, %v794_v6 }
 0x21e   : > { %819 = vrot.lane.b32.xlu1 %v817_v18, %s1260_s26 }
 0x226   : > { %825 = vperm.xlu1 %1142, %v816_v43  }
 0x22e   : > { %1143 = vset.pattern.permute.xlu1 %v1261_v19 }
 0x290   : > { %v820_v21 = vpop.permute.xlu1 %819 }
 0x291   : > { %v822_v22 = vsub.f32 %v804_v16, %v820_v21 }
 0x293   : > { %833 = vperm.xlu1 %1143, %v822_v22  }
 0x298   : > { %v826_v24 = vpop.permute.xlu1 %825 }
 0x299   : > { %v828_v25 = vmul.f32 %v826_v24, %v695_v20  ;;  %v829_v26 = vmul.f32 %v826_v24, %v721_v56  ;;  %v830_v27 = vmul.f32 %v826_v24, %v747_v50 }
 0x305   : > { %v834_v28 = vpop.permute.xlu1 %833 }
 0x306   : > { %v836_v29 = vadd.f32 %v834_v28, %v828_v25  ;;  %v837_v30 = vadd.f32 %v834_v28, %v829_v26  ;;  %v838_v33 = vadd.f32 %v834_v28, %v830_v27 }
 0x308   : > { %839 = vst [vmem:[%s190_s7] sm:$0xff] %v836_v29 }
 0x309   : > { %840 = vst [vmem:[%s190_s7 + $0x8] sm:$0xff] %v837_v30 }
 0x30a   : > { %841 = vst [vmem:[%s190_s7 + $0x10] sm:$0xff] %v838_v33 }
 0x30b   : > { %1206 = shalt.err (!%p1203_p4)
}
 0x30c   : > { %1083 = dma.vmem_to_hbm [thread:$0]  (%p1332_p11), %s857_s23, 384, %s859_s8, %s843_s16  }
 0x30d PF: > { %s870_s29 = sand.u32 1, %s1233_s12   ;;  %p1520_p7 = scmp.ge.s32.totalorder %s1245_s15, 2 }
 0x30e   : > { %s871_s27 = scalar_lea.sflag [#allocation5], %s870_s29 }
 0x30f   : > { %p1090_p5 = pnand %p1520_p7, %p1336_p12 }
 0x311   : > { %p1091_p8 = pneg %p1090_p5 }
 0x313   : > { %1228 = dma.done.wait (%p1091_p8), %s871_s27, 384  }
 0x314   : > { %1230 = vsyncadd (%p1091_p8), %s871_s27, 4294966912  ;;  %p16_p10 = scmp.ge.s32.totalorder %s1307_s18, 4   ;;  %s1521_s12 = smov %s1237_s13 }
 0x315   : > { %s1522_s13 = smov %s1241_s14  ;;  %s1523_s14 = smov %s1319_s21 }
 0x316   : > { %s1524_s15 = smov %s1307_s18  ;;  %18 = sbr.rel (!%p16_p10) target bundleno = 5 (0x5), region = 77 }
 0x31b   :  { %877 = vsyncpa [#allocation4], 1 }
 0x31c   :  { %879 = vsyncpa [#allocation4 + $0x1], 1 }
 0x31d   :  { %880 = vsyncpa [#allocation5], 1 }
 0x31e   :  { %882 = vsyncpa [#allocation5 + $0x1], 1 }

</bundles_post_ra>
